<compile_context>
chip_gen: v6e
topology: v6e:2x2x1
jax: 0.10.0
libtpu: 0.0.40
codegen_flags: <defaults>
</compile_context>

<pallas_src>
import jax
import jax.numpy as jnp
from jax.experimental import pallas as pl
from jax.experimental.pallas import tpu as pltpu

HIDDEN = 128           # hidden width of each projector (fixed by the PyTorch module)
SLAB = 2 * HIDDEN      # packed output slab: [ z_pad (128 lanes) | c_pad (128 lanes) ]
NEG_INF = -1e30        # bias on padded cluster lanes -> softmax prob exactly 0 (f32 exp underflow)


def _round_up(n, m):
    return ((n + m - 1) // m) * m


def _modified_network_kernel(x_ref, w1_ref, b1_ref,
                             wi2_ref, bi2_ref, wc2_ref, bc2_ref, out_ref):
    """One batch tile; fused layer-1, split per-head layer-2, exact epilogue math."""
    # In-kernel bf16 cast of the streamed f32 tile (free VPU work under the matmul).
    x = x_ref[...].astype(jnp.bfloat16)                              # (TB, D_in)

    # Layer 1 (instance + cluster fused):  (TB, D_in) @ (D_in, 256) -> f32
    h = jnp.dot(x, w1_ref[...], preferred_element_type=jnp.float32) + b1_ref[...]
    h = jnp.maximum(h, 0.0)                                          # ReLU in f32
    h_bf = h.astype(jnp.bfloat16)

    # ---- Instance head: Linear(128, feature_dim) + L2 normalize -------------------
    z = jnp.dot(h_bf[:, :HIDDEN], wi2_ref[...],
                preferred_element_type=jnp.float32) + bi2_ref[...]   # pad lanes == 0
    sumsq = jnp.sum(z * z, axis=-1, keepdims=True)
    z_n = z * jax.lax.rsqrt(jnp.maximum(sumsq, 1e-24))               # == x / max(||x||,1e-12)

    # ---- Cluster head: Linear(128, class_num) + Softmax ---------------------------
    logits = jnp.dot(h_bf[:, HIDDEN:], wc2_ref[...],
                     preferred_element_type=jnp.float32) + bc2_ref[...]  # pad lanes -1e30
    m = jnp.max(logits, axis=-1, keepdims=True)
    e = jnp.exp(logits - m)                                          # pad lanes -> exactly 0
    c = e / jnp.sum(e, axis=-1, keepdims=True)                       # exact division

    # Lane-dense, 128-aligned unmasked stores (no concatenate temporary).
    out_ref[:, :HIDDEN] = z_n
    out_ref[:, HIDDEN:] = c


def _pack_params(params):
    """Fuse layer-1, lane-pad layer-2 heads into MXU-friendly bf16 operands."""
    d_in = params["wi1"].shape[0]
    f_dim = params["wi2"].shape[1]
    c_num = params["wc2"].shape[1]
    assert f_dim <= HIDDEN and c_num <= HIDDEN
    # TODO(synk): feature_dim/class_num > 128 would need a tiled (un-padded) layer-2.

    # Fused layer-1 weight/bias (both projectors share LHS x).
    w1 = jnp.concatenate([params["wi1"], params["wc1"]], axis=1).astype(jnp.bfloat16)   # (D_in, 256)
    b1 = jnp.concatenate([params["bi1"], params["bc1"]], axis=1).astype(jnp.float32)    # (1, 256)

    # Instance head: zero-padded to 128 output lanes (pad lanes of z are exactly 0).
    wi2 = jnp.zeros((HIDDEN, HIDDEN), jnp.float32)
    wi2 = wi2.at[:, :f_dim].set(params["wi2"]).astype(jnp.bfloat16)
    bi2 = jnp.zeros((1, HIDDEN), jnp.float32)
    bi2 = bi2.at[:, :f_dim].set(params["bi2"].reshape(1, -1))

    # Cluster head: zero-padded weight, -1e30 bias on padded lanes (softmax -> 0).
    wc2 = jnp.zeros((HIDDEN, HIDDEN), jnp.float32)
    wc2 = wc2.at[:, :c_num].set(params["wc2"]).astype(jnp.bfloat16)
    bc2 = jnp.full((1, HIDDEN), NEG_INF, jnp.float32)
    bc2 = bc2.at[:, :c_num].set(params["bc2"].reshape(1, -1))

    return w1, b1, wi2, bi2, wc2, bc2, d_in, f_dim, c_num


def modified_network_forward(x, params, *, tile_b=512):
    """Pallas forward pass of ModifiedNetwork. Returns (z, c) like the PyTorch module."""
    B = x.shape[0]
    w1, b1, wi2, bi2, wc2, bc2, d_in, f_dim, c_num = _pack_params(params)

    # Batch tiling: multiples of 16 (bf16 sublane packing); cap the tile so there are
    # >= 2 grid steps when the batch allows it (megacore sharding on v7x).
    b16 = _round_up(B, 16)
    tb = min(tile_b, b16)
    if b16 >= 32:
        tb = min(tb, _round_up((b16 + 1) // 2, 16))
    b_pad = _round_up(b16, tb)

    x_p = x.astype(jnp.float32)                      # keep f32: cast happens in-kernel
    if b_pad != B:
        x_p = jnp.pad(x_p, ((0, b_pad - B), (0, 0)))
    grid = (b_pad // tb,)

    cost = pl.CostEstimate(
        flops=2 * b_pad * d_in * SLAB + 2 * 2 * b_pad * HIDDEN * HIDDEN,
        transcendentals=b_pad * (HIDDEN + 1),
        bytes_accessed=(x_p.size * 4 + w1.size * 2
                        + (wi2.size + wc2.size) * 2
                        + (b1.size + bi2.size + bc2.size) * 4
                        + b_pad * SLAB * 4),
    )

    out = pl.pallas_call(
        _modified_network_kernel,
        out_shape=jax.ShapeDtypeStruct((b_pad, SLAB), jnp.float32),
        grid=grid,
        in_specs=[
            pl.BlockSpec((tb, d_in), lambda i: (i, 0)),        # x: streamed per batch tile
            pl.BlockSpec((d_in, SLAB), lambda i: (0, 0)),      # W1 (fused): VMEM-resident
            pl.BlockSpec((1, SLAB), lambda i: (0, 0)),         # b1
            pl.BlockSpec((HIDDEN, HIDDEN), lambda i: (0, 0)),  # Wi2
            pl.BlockSpec((1, HIDDEN), lambda i: (0, 0)),       # bi2
            pl.BlockSpec((HIDDEN, HIDDEN), lambda i: (0, 0)),  # Wc2
            pl.BlockSpec((1, HIDDEN), lambda i: (0, 0)),       # bc2
        ],
        out_specs=pl.BlockSpec((tb, SLAB), lambda i: (i, 0)),
        compiler_params=pltpu.CompilerParams(
            dimension_semantics=("parallel",),                 # megacore on v7x
            vmem_limit_bytes=32 * 1024 * 1024,
        ),
        cost_estimate=cost,
    )(x_p, w1, b1, wi2, bi2, wc2, bc2)

    z = out[:B, :f_dim]
    c = out[:B, HIDDEN:HIDDEN + c_num]
    return z, c


def init_params(key, input_dim, feature_dim, class_num, hidden=HIDDEN):
    """Deterministic synthetic parameters (PyTorch Linear-style uniform init)."""
    def linear(k, fan_in, fan_out):
        k_w, k_b = jax.random.split(k)
        bound = 1.0 / jnp.sqrt(fan_in)
        w = jax.random.uniform(k_w, (fan_in, fan_out), jnp.float32, -bound, bound)
        b = jax.random.uniform(k_b, (1, fan_out), jnp.float32, -bound, bound)
        return w, b

    k1, k2, k3, k4 = jax.random.split(key, 4)
    wi1, bi1 = linear(k1, input_dim, hidden)
    wi2, bi2 = linear(k2, hidden, feature_dim)
    wc1, bc1 = linear(k3, input_dim, hidden)
    wc2, bc2 = linear(k4, hidden, class_num)
    return {
        "wi1": wi1, "bi1": bi1, "wi2": wi2, "bi2": bi2,
        "wc1": wc1, "bc1": bc1, "wc2": wc2, "bc2": bc2,
    }


def reference_forward(x, p):
    """Plain-JAX f32 reference mirroring the PyTorch module."""
    h_i = jnp.maximum(x @ p["wi1"] + p["bi1"], 0.0)
    z = h_i @ p["wi2"] + p["bi2"]
    z = z / jnp.maximum(jnp.linalg.norm(z, axis=1, keepdims=True), 1e-12)
    h_c = jnp.maximum(x @ p["wc1"] + p["bc1"], 0.0)
    c = jax.nn.softmax(h_c @ p["wc2"] + p["bc2"], axis=1)
    return z, c


if __name__ == "__main__":
    # Small shapes consistent with the module's forward (x is (batch, input_dim)).
    B, input_dim, feature_dim, class_num = 8, 32, 16, 10

    key = jax.random.PRNGKey(0)
    k_x, k_p = jax.random.split(key)
    x = jax.random.normal(k_x, (B, input_dim), dtype=jnp.float32)
    params = init_params(k_p, input_dim, feature_dim, class_num)

    z, c = modified_network_forward(x, params)
    jax.block_until_ready((z, c))

    z_ref, c_ref = reference_forward(x, params)
    assert z.shape == (B, feature_dim) and c.shape == (B, class_num)
    # bf16 matmul operands -> loosened tolerance vs the all-f32 reference.
    assert jnp.allclose(z, z_ref, atol=2e-2, rtol=2e-2), float(jnp.max(jnp.abs(z - z_ref)))
    assert jnp.allclose(c, c_ref, atol=2e-2, rtol=2e-2), float(jnp.max(jnp.abs(c - c_ref)))
    # Exact f32 division in the softmax epilogue -> rows sum to 1 tightly.
    assert jnp.allclose(jnp.sum(c, axis=1), 1.0, atol=1e-5)
    # Unit-norm rows from the exact rsqrt normalize.
    assert jnp.allclose(jnp.linalg.norm(z, axis=1), 1.0, atol=1e-4)

    print("KERNEL_OK")
</pallas_src>

<mosaic_0001>
module attributes {stable_mosaic.version = 11 : i64} {
  func.func @_modified_network_kernel(%arg0: i32, %arg1: memref<16x32xf32, #tpu.memory_space<vmem>>, %arg2: memref<32x256xbf16, #tpu.memory_space<vmem>>, %arg3: memref<1x256xf32, #tpu.memory_space<vmem>>, %arg4: memref<128x128xbf16, #tpu.memory_space<vmem>>, %arg5: memref<1x128xf32, #tpu.memory_space<vmem>>, %arg6: memref<128x128xbf16, #tpu.memory_space<vmem>>, %arg7: memref<1x128xf32, #tpu.memory_space<vmem>>, %arg8: memref<16x256xf32, #tpu.memory_space<vmem>>) attributes {dimension_semantics = [#tpu.dimension_semantics<parallel>], iteration_bounds = array<i64: 1>, scalar_prefetch = 0 : i64, scratch_operands = 0 : i64, tpu.core_type = #tpu.core_type<tc>, window_params = [{transform_indices = @transform_0, window_bounds = array<i64: 16, 32>}, {pipeline_mode = #tpu.pipeline_mode<synchronous>, transform_indices = @transform_1, window_bounds = array<i64: 32, 256>}, {pipeline_mode = #tpu.pipeline_mode<synchronous>, transform_indices = @transform_2, window_bounds = array<i64: 1, 256>}, {pipeline_mode = #tpu.pipeline_mode<synchronous>, transform_indices = @transform_3, window_bounds = array<i64: 128, 128>}, {pipeline_mode = #tpu.pipeline_mode<synchronous>, transform_indices = @transform_4, window_bounds = array<i64: 1, 128>}, {pipeline_mode = #tpu.pipeline_mode<synchronous>, transform_indices = @transform_5, window_bounds = array<i64: 128, 128>}, {pipeline_mode = #tpu.pipeline_mode<synchronous>, transform_indices = @transform_6, window_bounds = array<i64: 1, 128>}, {transform_indices = @transform_7, window_bounds = array<i64: 16, 256>}]} {
    %c0 = arith.constant 0 : index
    %c0_0 = arith.constant 0 : index
    %0 = vector.load %arg1[%c0, %c0_0] : memref<16x32xf32, #tpu.memory_space<vmem>>, vector<16x32xf32>
    %1 = arith.truncf %0 : vector<16x32xf32> to vector<16x32xbf16>
    %c0_1 = arith.constant 0 : index
    %c0_2 = arith.constant 0 : index
    %2 = vector.load %arg2[%c0_1, %c0_2] : memref<32x256xbf16, #tpu.memory_space<vmem>>, vector<32x256xbf16>
    %cst = arith.constant dense<0.000000e+00> : vector<16x256xf32>
    %3 = tpu.matmul %1, %2, %cst {dimension_numbers = #tpu.dot_dimension_numbers<[1], [0], [0], [1], [0, 0, 1, 1], [], []>} : vector<16x32xbf16>, vector<32x256xbf16>, vector<16x256xf32> -> vector<16x256xf32>
    %c0_3 = arith.constant 0 : index
    %c0_4 = arith.constant 0 : index
    %4 = vector.load %arg3[%c0_3, %c0_4] : memref<1x256xf32, #tpu.memory_space<vmem>>, vector<1x256xf32>
    %5 = vector.broadcast %4 : vector<1x256xf32> to vector<16x256xf32>
    %6 = arith.addf %3, %5 : vector<16x256xf32>
    %cst_5 = arith.constant 0.000000e+00 : f32
    %7 = vector.broadcast %cst_5 : f32 to vector<16x256xf32>
    %8 = arith.maximumf %6, %7 : vector<16x256xf32>
    %9 = arith.truncf %8 : vector<16x256xf32> to vector<16x256xbf16>
    %10 = vector.extract_strided_slice %9 {offsets = [0, 0], sizes = [16, 128], strides = [1, 1]} : vector<16x256xbf16> to vector<16x128xbf16>
    %c0_6 = arith.constant 0 : index
    %c0_7 = arith.constant 0 : index
    %11 = vector.load %arg4[%c0_6, %c0_7] : memref<128x128xbf16, #tpu.memory_space<vmem>>, vector<128x128xbf16>
    %cst_8 = arith.constant dense<0.000000e+00> : vector<16x128xf32>
    %12 = tpu.matmul %10, %11, %cst_8 {dimension_numbers = #tpu.dot_dimension_numbers<[1], [0], [0], [1], [0, 0, 1, 1], [], []>} : vector<16x128xbf16>, vector<128x128xbf16>, vector<16x128xf32> -> vector<16x128xf32>
    %c0_9 = arith.constant 0 : index
    %c0_10 = arith.constant 0 : index
    %13 = vector.load %arg5[%c0_9, %c0_10] : memref<1x128xf32, #tpu.memory_space<vmem>>, vector<1x128xf32>
    %14 = vector.broadcast %13 : vector<1x128xf32> to vector<16x128xf32>
    %15 = arith.addf %12, %14 : vector<16x128xf32>
    %16 = arith.mulf %15, %15 : vector<16x128xf32>
    %cst_11 = arith.constant dense<0.000000e+00> : vector<16xf32>
    %17 = vector.multi_reduction <add>, %16, %cst_11 [1] : vector<16x128xf32> to vector<16xf32>
    %18 = vector.shape_cast %17 : vector<16xf32> to vector<16x1xf32>
    %cst_12 = arith.constant 1.000000e-24 : f32
    %19 = vector.broadcast %cst_12 : f32 to vector<16x1xf32>
    %20 = arith.maximumf %18, %19 : vector<16x1xf32>
    %21 = math.rsqrt %20 : vector<16x1xf32>
    %22 = vector.broadcast %21 : vector<16x1xf32> to vector<16x128xf32>
    %23 = arith.mulf %15, %22 : vector<16x128xf32>
    %24 = vector.extract_strided_slice %9 {offsets = [0, 128], sizes = [16, 128], strides = [1, 1]} : vector<16x256xbf16> to vector<16x128xbf16>
    %c0_13 = arith.constant 0 : index
    %c0_14 = arith.constant 0 : index
    %25 = vector.load %arg6[%c0_13, %c0_14] : memref<128x128xbf16, #tpu.memory_space<vmem>>, vector<128x128xbf16>
    %cst_15 = arith.constant dense<0.000000e+00> : vector<16x128xf32>
    %26 = tpu.matmul %24, %25, %cst_15 {dimension_numbers = #tpu.dot_dimension_numbers<[1], [0], [0], [1], [0, 0, 1, 1], [], []>} : vector<16x128xbf16>, vector<128x128xbf16>, vector<16x128xf32> -> vector<16x128xf32>
    %c0_16 = arith.constant 0 : index
    %c0_17 = arith.constant 0 : index
    %27 = vector.load %arg7[%c0_16, %c0_17] : memref<1x128xf32, #tpu.memory_space<vmem>>, vector<1x128xf32>
    %28 = vector.broadcast %27 : vector<1x128xf32> to vector<16x128xf32>
    %29 = arith.addf %26, %28 : vector<16x128xf32>
    %cst_18 = arith.constant dense<0xFF800000> : vector<16xf32>
    %30 = vector.multi_reduction <maximumf>, %29, %cst_18 [1] : vector<16x128xf32> to vector<16xf32>
    %31 = vector.shape_cast %30 : vector<16xf32> to vector<16x1xf32>
    %32 = vector.broadcast %31 : vector<16x1xf32> to vector<16x128xf32>
    %33 = arith.subf %29, %32 : vector<16x128xf32>
    %34 = math.exp %33 : vector<16x128xf32>
    %cst_19 = arith.constant dense<0.000000e+00> : vector<16xf32>
    %35 = vector.multi_reduction <add>, %34, %cst_19 [1] : vector<16x128xf32> to vector<16xf32>
    %36 = vector.shape_cast %35 : vector<16xf32> to vector<16x1xf32>
    %37 = vector.broadcast %36 : vector<16x1xf32> to vector<16x128xf32>
    %38 = arith.divf %34, %37 : vector<16x128xf32>
    %c0_20 = arith.constant 0 : index
    %c0_21 = arith.constant 0 : index
    %39 = vector.load %arg8[%c0_20, %c0_21] : memref<16x256xf32, #tpu.memory_space<vmem>>, vector<16x128xf32>
    tpu.vector_store %arg8[%c0_20, %c0_21], %23 {strides = array<i32>} : memref<16x256xf32, #tpu.memory_space<vmem>>, vector<16x128xf32>,
    %c0_22 = arith.constant 0 : index
    %c128 = arith.constant 128 : index
    %40 = vector.load %arg8[%c0_22, %c128] : memref<16x256xf32, #tpu.memory_space<vmem>>, vector<16x128xf32>
    tpu.vector_store %arg8[%c0_22, %c128], %38 {strides = array<i32>} : memref<16x256xf32, #tpu.memory_space<vmem>>, vector<16x128xf32>,
    return
  }
  func.func @transform_0(%arg0: i32) -> (i32, i32) {
    %c0_i32 = arith.constant 0 : i32
    %c0_i32_0 = arith.constant 0 : i32
    return %arg0, %c0_i32 : i32, i32
  }
  func.func @transform_1(%arg0: i32) -> (i32, i32) {
    %c0_i32 = arith.constant 0 : i32
    %c0_i32_0 = arith.constant 0 : i32
    %c0_i32_1 = arith.constant 0 : i32
    return %c0_i32, %c0_i32_0 : i32, i32
  }
  func.func @transform_2(%arg0: i32) -> (i32, i32) {
    %c0_i32 = arith.constant 0 : i32
    %c0_i32_0 = arith.constant 0 : i32
    %c0_i32_1 = arith.constant 0 : i32
    return %c0_i32, %c0_i32_0 : i32, i32
  }
  func.func @transform_3(%arg0: i32) -> (i32, i32) {
    %c0_i32 = arith.constant 0 : i32
    %c0_i32_0 = arith.constant 0 : i32
    %c0_i32_1 = arith.constant 0 : i32
    return %c0_i32, %c0_i32_0 : i32, i32
  }
  func.func @transform_4(%arg0: i32) -> (i32, i32) {
    %c0_i32 = arith.constant 0 : i32
    %c0_i32_0 = arith.constant 0 : i32
    %c0_i32_1 = arith.constant 0 : i32
    return %c0_i32, %c0_i32_0 : i32, i32
  }
  func.func @transform_5(%arg0: i32) -> (i32, i32) {
    %c0_i32 = arith.constant 0 : i32
    %c0_i32_0 = arith.constant 0 : i32
    %c0_i32_1 = arith.constant 0 : i32
    return %c0_i32, %c0_i32_0 : i32, i32
  }
  func.func @transform_6(%arg0: i32) -> (i32, i32) {
    %c0_i32 = arith.constant 0 : i32
    %c0_i32_0 = arith.constant 0 : i32
    %c0_i32_1 = arith.constant 0 : i32
    return %c0_i32, %c0_i32_0 : i32, i32
  }
  func.func @transform_7(%arg0: i32) -> (i32, i32) {
    %c0_i32 = arith.constant 0 : i32
    %c0_i32_0 = arith.constant 0 : i32
    return %arg0, %c0_i32 : i32, i32
  }
}

</mosaic_0001>

<bundles_post_ra>
// kernel: tpu_custom_call.1
= control target key start
LH: loop header
LB: loop body
LE: loop exit
PB: predicated region body
PF: predicated region fallthrough
CT: control target
= control target key end

     0   :  { %12 = vsyncpa [#allocation3], 0  ;;  %s785_s0 = inlined_call_operand.hbm [shape: f32[16,32], index: 0, kind: input, shape index: {}]   ;;  %s786_s1 = inlined_call_operand.hbm [shape: bf16[32,256], index: 1, kind: input, shape index: {}]   ;;  %s787_s2 = inlined_call_operand.vmem [shape: f32[1,256], index: 2, kind: input, shape index: {}]   ;;  %s788_s3 = inlined_call_operand.hbm [shape: bf16[128,128], index: 3, kind: input, shape index: {}]   ;;  %s789_s4 = inlined_call_operand.vmem [shape: f32[1,128], index: 4, kind: input, shape index: {}]   ;;  %s790_s5 = inlined_call_operand.hbm [shape: bf16[128,128], index: 5, kind: input, shape index: {}]   ;;  %s791_s6 = inlined_call_operand.vmem [shape: f32[1,128], index: 6, kind: input, shape index: {}]   ;;  %s792_s7 = inlined_call_operand.hbm [shape: f32[16,256], index: 7, kind: output, shape index: {}]  }
   0x1   :  { %13 = vsyncpa [#allocation6], 0 }
   0x2   :  { %14 = vsyncpa [#allocation9], 0 }
   0x3   :  { %15 = vsyncpa [#allocation4], 0  ;;  %s689_s24 = smov [#allocation5]   ;;  %s690_s26 = smov [#allocation2]  }
   0x4   :  { %s33_s25 = sshll.u32 %s689_s24, 4  ;;  %s21_s27 = sshll.u32 %s690_s26, 4  ;;  %s34_s25 = int_to_ptr.vmem [resolvable:$true] %s33_s25  ;;  %s22_s27 = int_to_ptr.vmem [resolvable:$true] %s21_s27 }
   0x5   :  { %s589_s28 = scalar_lea.vmem %s34_s25, 512  ;;  %p594_p1 = scmp.lt.s32.totalorder %s34_s25, %s34_s25 }
   0x6   :  { %p590_p0 = scmp.ne.s32.totalorder %s34_s25, %s589_s28  ;;  %p595_p2 = scmp.lt.s32.totalorder %s589_s28, %s589_s28 }
   0x8   :  { %p596_p3 = por %p595_p2, %p594_p1 }
   0xa   :  { %p597_p4 = pnand %p596_p3, %p590_p0 }
   0xc   :  { %600 = shalt.err (!%p597_p4)
}
   0xd   :  { %s691_s29 = smov 128   ;;  %s692_s30 = smov 8  }
   0xe   :  { %39 = dma.hbm_to_vmem [thread:$0]  %s786_s1, 512, %s34_s25, [#allocation6], %s691_s29, %s691_s29, %s692_s30  }
   0xf   :  { %s609_s10 = scalar_lea.vmem %s22_s27, 256  ;;  %p614_p6 = scmp.lt.s32.totalorder %s22_s27, %s22_s27 }
  0x10   :  { %p610_p5 = scmp.ne.s32.totalorder %s22_s27, %s609_s10  ;;  %p615_p7 = scmp.lt.s32.totalorder %s609_s10, %s609_s10 }
  0x12   :  { %p616_p8 = por %p615_p7, %p614_p6 }
  0x14   :  { %p617_p9 = pnand %p616_p8, %p610_p5 }
  0x16   :  { %620 = shalt.err (!%p617_p9)
}
  0x17   :  { %27 = dma.hbm_to_vmem [thread:$0]  %s785_s0, 256, %s22_s27, [#allocation3], %s691_s29, %s691_s29, %s692_s30  }
  0x18   :  { %s693_s13 = smov [#allocation7]  }
  0x19   :  { %s47_s14 = sshll.u32 %s693_s13, 4  ;;  %s48_s14 = int_to_ptr.vmem [resolvable:$true] %s47_s14 }
  0x1a   :  { %s629_s15 = scalar_lea.vmem %s48_s14, 1024  ;;  %p634_p11 = scmp.lt.s32.totalorder %s48_s14, %s48_s14 }
  0x1b   :  { %p630_p10 = scmp.ne.s32.totalorder %s48_s14, %s629_s15  ;;  %p635_p12 = scmp.lt.s32.totalorder %s629_s15, %s629_s15 }
  0x1d   :  { %p636_p13 = por %p635_p12, %p634_p11 }
  0x1f   :  { %p637_p0 = pnand %p636_p13, %p630_p10 }
  0x21   :  { %640 = shalt.err (!%p637_p0)
}
  0x22   :  { %s694_s1 = smov 64   ;;  %s695_s16 = smov 4  }
  0x23   :  { %53 = dma.hbm_to_vmem [thread:$0]  %s788_s3, 1024, %s48_s14, [#allocation6], %s694_s1, %s694_s1, %s695_s16  }
  0x24   :  { %s696_s19 = smov [#allocation8]  }
  0x25   :  { %s61_s20 = sshll.u32 %s696_s19, 4  ;;  %s62_s20 = int_to_ptr.vmem [resolvable:$true] %s61_s20 }
  0x26   :  { %s649_s0 = scalar_lea.vmem %s62_s20, 1024  ;;  %p654_p2 = scmp.lt.s32.totalorder %s62_s20, %s62_s20 }
  0x27   :  { %p650_p1 = scmp.ne.s32.totalorder %s62_s20, %s649_s0  ;;  %p655_p3 = scmp.lt.s32.totalorder %s649_s0, %s649_s0 }
  0x29   :  { %p656_p4 = por %p655_p3, %p654_p2 }
  0x2b   :  { %p657_p5 = pnand %p656_p4, %p650_p1 }
  0x2d   :  { %660 = shalt.err (!%p657_p5)
}
  0x2e   :  { %67 = dma.hbm_to_vmem [thread:$0]  %s790_s5, 1024, %s62_s20, [#allocation9], %s694_s1, %s694_s1, %s695_s16  }
  0x2f   :  { %681 = dma.done.wait [#allocation3], 256  }
  0x30   :  { %682 = vsyncadd [#allocation3], 4294967040 }
  0x31   :  { %683 = dma.done.wait [#allocation6], 1536  }
  0x32   :  { %684 = vsyncadd [#allocation6], 4294965760 }
  0x33   :  { %685 = dma.done.wait [#allocation9], 1024  }
  0x34   :  { %686 = vsyncadd [#allocation9], 4294966272  ;;  %v697_v0 = vmov 0   ;;  %v698_v1 = vmov 0.0   ;;  %v547_v2 = vld [vmem:[#allocation5 + $0x14] ss:$8 sps:$4 sm:$0xff]   ;;  %v92_v25 = vlaneseq }
  0x35   :  { %158 = vmatprep.mubr.bf16.mxu0 %v697_v0  ;;  %493 = vmatprep.subr.bf16.mxu1 %v698_v1  ;;  %v549_v3 = vld [vmem:[#allocation5 + $0x10] ss:$8 sps:$4 sm:$0xff]   ;;  %v550_v4 = vld [vmem:[#allocation5 + $0x4] ss:$8 sps:$4 sm:$0xff]   ;;  %v552_v5 = vld [vmem:[#allocation5] ss:$8 sps:$4 sm:$0xff]  }
  0x36   :  { %138 = vmatprep.subr.bf16.mxu0 %v547_v2  ;;  %v83_v6 = vld [vmem:[#allocation2] sm:$0xff]  ;;  %v84_v7 = vld [vmem:[#allocation2 + $0x8] sm:$0xff]  ;;  %vm122_vm0 = vcmask 261120   ;;  %v557_v12 = vld [vmem:[#allocation7 + $0x28] sm:$0xff]   ;;  %vm699_vm1 = vmmov 0   ;;  %v93_v26 = vshrl.u32 %v92_v25, 7 }
  0x37   :  { %139 = vmatpush1.bf16.msra.mxu0 %v549_v3  ;;  %v553_v8 = vld [vmem:[#allocation7 + $0x38] sm:$0xff]   ;;  %v85_v9 = vpack.c.bf16 %v84_v7, %v83_v6  ;;  %v555_v10 = vld [vmem:[#allocation7 + $0x30] sm:$0xff]   ;;  %v558_v14 = vld [vmem:[#allocation8 + $0x28] sm:$0xff]   ;;  %509 = vmatprep.mubr.msk.bf16.mxu1 %vm699_vm1, %v698_v1 }
  0x38   :  { %140 = vmatprep.subr.bf16.mxu0 %v550_v4  ;;  %494 = vmatpush3.bf16.msra.mxu1 %v553_v8  ;;  %v554_v11 = vld [vmem:[#allocation8 + $0x38] sm:$0xff]   ;;  %v556_v13 = vld [vmem:[#allocation8 + $0x30] sm:$0xff]   ;;  %v559_v15 = vld [vmem:[#allocation7 + $0x20] sm:$0xff]   ;;  %v94_v27 = vsub.s32 0, %v93_v26  ;;  %v98_v29 = vsub.s32 1, %v93_v26 }
  0x39   :  { %495 = vmatprep.subr.bf16.mxu1 %v698_v1  ;;  %v561_v16 = vld [vmem:[#allocation7 + $0x18] sm:$0xff]   ;;  %v560_v17 = vld [vmem:[#allocation8 + $0x20] sm:$0xff]   ;;  %v563_v19 = vld [vmem:[#allocation7 + $0x10] sm:$0xff]  }
  0x3a   :  { %v562_v18 = vld [vmem:[#allocation8 + $0x18] sm:$0xff]   ;;  %v564_v20 = vld [vmem:[#allocation8 + $0x10] sm:$0xff]   ;;  %v565_v21 = vld [vmem:[#allocation7 + $0x8] sm:$0xff]  }
  0x3b   :  { %141 = vmatpush1.bf16.msra.mxu0 %v552_v5  ;;  %v566_v22 = vld [vmem:[#allocation8 + $0x8] sm:$0xff]   ;;  %v567_v23 = vld [vmem:[#allocation7] sm:$0xff]   ;;  %v90_v28 = vld [vmem:[%s787_s2] sm:$0x3] }
  0x3c   :  { %513 = vmatprep.subr.bf16.mxu0 %v698_v1  ;;  %496 = vmatpush3.bf16.msra.mxu1 %v555_v10  ;;  %v568_v24 = vld [vmem:[#allocation8] sm:$0xff]   ;;  %v95_v30 = vrot.slane %v90_v28, %v94_v27  ;;  %v99_v32 = vrot.slane %v90_v28, %v98_v29  ;;  %v457_v46 = vld [vmem:[%s789_s4] ss:$0 sm:$0xff]  ;;  %s700_s4 = smov [#allocation10]  }
  0x3d   :  { %497 = vmatprep.subr.bf16.mxu1 %v698_v1  ;;  %v466_v48 = vld [vmem:[%s791_s6] ss:$0 sm:$0xff]  ;;  %s438_s6 = sshll.u32 %s700_s4, 4  ;;  %s439_s6 = int_to_ptr.vmem [resolvable:$true] %s438_s6 }
  0x3e   :  { %456 = vmatmul.mubr.msk.bf16.vlgmr.msra.gmra.mxu0 %vm122_vm0, %v85_v9  ;;  %s661_s26 = scalar_lea.vmem %s439_s6, 512  ;;  %p666_p7 = scmp.lt.s32.totalorder %s439_s6, %s439_s6 }
  0x3f   :  { %514 = vmatpush3.bf16.msra.mxu0 %v554_v11  ;;  %529 = vmatprep.mubr.msk.bf16.mxu0 %vm699_vm1, %v698_v1  ;;  %p662_p6 = scmp.ne.s32.totalorder %s439_s6, %s661_s26  ;;  %p667_p8 = scmp.lt.s32.totalorder %s661_s26, %s661_s26 }
  0x40   :  { %515 = vmatprep.subr.bf16.mxu0 %v698_v1  ;;  %498 = vmatpush3.bf16.msra.mxu1 %v557_v12 }
  0x41   :  { %499 = vmatprep.subr.bf16.mxu1 %v698_v1  ;;  %p668_p9 = por %p667_p8, %p666_p7 }
  0x43   :  { %516 = vmatpush3.bf16.msra.mxu0 %v556_v13  ;;  %p669_p10 = pnand %p668_p9, %p662_p6 }
  0x44   :  { %517 = vmatprep.subr.bf16.mxu0 %v698_v1  ;;  %500 = vmatpush3.bf16.msra.mxu1 %v559_v15 }
  0x45   :  { %501 = vmatprep.subr.bf16.mxu1 %v698_v1 }
  0x47   :  { %518 = vmatpush3.bf16.msra.mxu0 %v558_v14 }
  0x48   :  { %519 = vmatprep.subr.bf16.mxu0 %v698_v1  ;;  %502 = vmatpush3.bf16.msra.mxu1 %v561_v16 }
  0x49   :  { %503 = vmatprep.subr.bf16.mxu1 %v698_v1 }
  0x4b   :  { %520 = vmatpush3.bf16.msra.mxu0 %v560_v17 }
  0x4c   :  { %521 = vmatprep.subr.bf16.mxu0 %v698_v1  ;;  %504 = vmatpush3.bf16.msra.mxu1 %v563_v19 }
  0x4d   :  { %505 = vmatprep.subr.bf16.mxu1 %v698_v1 }
  0x4f   :  { %522 = vmatpush3.bf16.msra.mxu0 %v562_v18 }
  0x50   :  { %523 = vmatprep.subr.bf16.mxu0 %v698_v1  ;;  %506 = vmatpush3.bf16.msra.mxu1 %v565_v21 }
  0x51   :  { %507 = vmatprep.subr.bf16.mxu1 %v698_v1 }
  0x53   :  { %524 = vmatpush3.bf16.msra.mxu0 %v564_v20 }
  0x54   :  { %525 = vmatprep.subr.bf16.mxu0 %v698_v1  ;;  %508 = vmatpush3.bf16.msra.mxu1 %v567_v23 }
  0x57   :  { %526 = vmatpush3.bf16.msra.mxu0 %v566_v22 }
  0x58   :  { %527 = vmatprep.subr.bf16.mxu0 %v698_v1 }
  0x5b   :  { %528 = vmatpush3.bf16.msra.mxu0 %v568_v24 }
  0xfe   :  { %v160_v31 = vpop.f32.mrf.mxu0 }
  0xff   :  { %v161_v34 = vadd.f32 %v160_v31, %v95_v30 }
 0x100   :  { %v162_v33 = vpop.f32.mrf.mxu0 }
 0x101   :  { %v163_v36 = vadd.f32 %v162_v33, %v99_v32  ;;  %v169_v39 = vmax.f32 %v161_v34, 0.0 }
 0x102   :  { %v164_v35 = vpop.f32.mrf.mxu0 }
 0x103   :  { %v165_v37 = vadd.f32 %v164_v35, %v95_v30  ;;  %v170_v42 = vmax.f32 %v163_v36, 0.0 }
 0x104   :  { %v166_v38 = vpop.f32.mrf.mxu0 }
 0x105   :  { %v171_v40 = vmax.f32 %v165_v37, 0.0  ;;  %v167_v41 = vadd.f32 %v166_v38, %v99_v32 }
 0x107   :  { %v173_v43 = vpack.c.bf16 %v171_v40, %v169_v39  ;;  %v172_v44 = vmax.f32 %v167_v41, 0.0 }
 0x109   :  { %v174_v45 = vpack.c.bf16 %v172_v44, %v170_v42  ;;  %510 = vmatmul.mubr.bf16.vlgmr.msra.gmra.mxu1 %v173_v43 }
 0x10b   :  { %530 = vmatmul.mubr.bf16.vlgmr.msra.gmra.mxu0 %v174_v45 }
 0x1c9   :  { %v280_v47 = vpop.f32.mrf.mxu1 }
 0x1ca   :  { %v281_v49 = vadd.f32 %v457_v46, %v280_v47 }
 0x1cb   :  { %v511_v50 = vpop.f32.mrf.mxu1  ;;  %v404_v51 = vpop.f32.mrf.mxu0 }
 0x1cc   :  { %v405_v52 = vadd.f32 %v466_v48, %v404_v51  ;;  %v287_v53 = vmul.f32 %v281_v49, %v281_v49 }
 0x1cd   :  { %v283_v54 = vpop.f32.mrf.mxu1  ;;  %v531_v55 = vpop.f32.mrf.mxu0 }
 0x1ce   :  { %v284_v56 = vadd.f32 %v457_v46, %v283_v54  ;;  %411 = vmax.xlane.f32.xlu0 %v405_v52  ;;  %289 = vadd.xlane.f32.xlu1 %v287_v53 }
 0x1cf   :  { %v512_v57 = vpop.f32.mrf.mxu1  ;;  %v407_v58 = vpop.f32.mrf.mxu0 }
 0x1d0   :  { %v408_v59 = vadd.f32 %v466_v48, %v407_v58  ;;  %v288_v60 = vmul.f32 %v284_v56, %v284_v56 }
 0x1d1   :  { %v532_v61 = vpop.f32.mrf.mxu0 }
 0x1d2   :  { %413 = vmax.xlane.f32.xlu0 %v408_v59  ;;  %291 = vadd.xlane.f32.xlu1 %v288_v60 }
 0x257   :  { %v412_v62 = vpop.xlane.xlu0 %411  ;;  %v290_v63 = vpop.xlane.xlu1 %289 }
 0x258   :  { %v415_v0 = vsub.f32 %v405_v52, %v412_v62  ;;  %v293_v1 = vmax.f32 %v290_v63, 1e-24 }
 0x25a   :  { %v417_v2 = vmul.f32 1.442695, %v415_v0  ;;  %569 = vrsqrt.f32 %v293_v1 }
 0x25b   :  { %v414_v3 = vpop.xlane.xlu0 %413  ;;  %v292_v4 = vpop.xlane.xlu1 %291 }
 0x25c   :  { %571 = vpow2.f32 %v417_v2  ;;  %v416_v5 = vsub.f32 %v408_v59, %v414_v3  ;;  %v294_v6 = vmax.f32 %v292_v4, 1e-24 }
 0x25e   :  { %v419_v7 = vmul.f32 1.442695, %v416_v5  ;;  %573 = vrsqrt.f32 %v294_v6 }
 0x260   :  { %575 = vpow2.f32 %v419_v7 }
 0x267   :  { %v570_v8 = vpop.eup %569 }
 0x268   :  { %v297_v9 = vmul.f32 %v570_v8, %v281_v49 }
 0x269   :  { %v572_v10 = vpop.eup %571 }
 0x26a   :  { %429 = vst [vmem:[#allocation10] sm:$0xff] %v297_v9  ;;  %421 = vadd.xlane.f32.xlu0 %v572_v10 }
 0x26b   :  { %v574_v11 = vpop.eup %573 }
 0x26c   :  { %v298_v12 = vmul.f32 %v574_v11, %v284_v56 }
 0x26d   :  { %v576_v13 = vpop.eup %575 }
 0x26e   :  { %430 = vst [vmem:[#allocation10 + $0x10] sm:$0xff] %v298_v12  ;;  %423 = vadd.xlane.f32.xlu1 %v576_v13 }
 0x2f3   :  { %v422_v14 = vpop.xlane.xlu0 %421 }
 0x2f4   :  { %577 = vrcp.f32 %v422_v14 }
 0x2f7   :  { %v424_v15 = vpop.xlane.xlu1 %423 }
 0x2f8   :  { %579 = vrcp.f32 %v424_v15 }
 0x301   :  { %v578_v16 = vpop.eup %577 }
 0x302   :  { %v426_v17 = vmul.f32 %v578_v16, %v572_v10 }
 0x304   :  { %431 = vst [vmem:[#allocation10 + $0x8] sm:$0xff] %v426_v17 }
 0x305   :  { %v580_v18 = vpop.eup %579 }
 0x306   :  { %v428_v19 = vmul.f32 %v580_v18, %v576_v13 }
 0x308   :  { %432 = vst [vmem:[#allocation10 + $0x18] sm:$0xff] %v428_v19 }
 0x309   :  { %672 = shalt.err (!%p669_p10)
}
 0x30a   :  { %s701_s27 = smov 256   ;;  %s702_s28 = smov 16  }
 0x30b   :  { %444 = dma.vmem_to_hbm [thread:$0]  %s439_s6, 512, %s792_s7, [#allocation4], %s701_s27, %s701_s27, %s702_s28  }
 0x30c   :  { %687 = dma.done.wait [#allocation4], 512  }
 0x30d   :  { %688 = vsyncadd [#allocation4], 4294966784 }
 0x30e   :  { %448 = vsyncpa [#allocation3], 1 }
 0x30f   :  { %449 = vsyncpa [#allocation6], 1 }
 0x310   :  { %450 = vsyncpa [#allocation9], 1 }
 0x311   :  { %451 = vsyncpa [#allocation4], 1 }

</bundles_post_ra>
